<compile_context>
chip_gen: v5e
topology: v5e:2x2
jax: 0.10.0
libtpu: 0.0.40
codegen_flags: <defaults>
</compile_context>

<pallas_src>
import functools

import jax
import jax.numpy as jnp
from jax.experimental import pallas as pl
from jax.experimental.pallas import tpu as pltpu


def attention_layer_kernel(inp_ref, src_ref, mask_ref, w_in_ref,
                           w_out_ctx_ref, w_out_in_ref,
                           x_out_ref, attn_sum_ref,
                           xp_ref, acc_ref, *, s_total, mask_tail):
    s = pl.program_id(1)

    # --- init (first srclen tile of this batch tile) ----------------------
    @pl.when(s == 0)
    def _():
        acc_ref[...] = jnp.zeros_like(acc_ref)
        xp_ref[...] = jnp.dot(inp_ref[...].astype(jnp.float32), w_in_ref[...],
                              preferred_element_type=jnp.float32)

    # --- per-srclen-tile softmax + context contribution -------------------
    src = src_ref[...].astype(jnp.float32)            # (TS, TB, Ds); bf16 -> f32
    if mask_tail:
        # Zero out-of-range srclen rows of a partial last tile so they cannot
        # contribute garbage to the context accumulation.
        ts = src_ref.shape[0]
        s_idx = jax.lax.broadcasted_iota(jnp.int32, (ts, 1, 1), 0) + s * ts
        src = jnp.where(s_idx < s_total, src, jnp.float32(0.0))

    xp = xp_ref[...]                                   # (TB, Ds)
    scores = src * xp[None, :, :]                      # (TS, TB, Ds)

    pad = mask_ref[...] != 0.0                         # (TS, TB, 1), lane-broadcast
    scores = jnp.where(pad, jnp.float32(-1000000.0), scores)

    # Softmax over the feature (lane) axis -- numerically stable.
    # TODO(synk): if production Ds << 128, repack several srclen rows per lane
    # row (segmented reduce) to recover lane occupancy.
    s_max = jnp.max(scores, axis=-1, keepdims=True)
    e = jnp.exp(scores - s_max)
    denom = jnp.sum(e, axis=-1, keepdims=True)
    inv = pl.reciprocal(denom, approx=True)            # EUP slot

    # ctx += sum_s softmax(scores) * src    (reciprocal folded in; no `attn`
    # tensor is materialized).
    acc_ref[...] += jnp.sum((e * src) * inv, axis=0)

    # attn.sum(dim=2) == denom / denom (~1.0); no cross-lane reduce needed.
    attn_sum_ref[...] = (denom * inv).astype(attn_sum_ref.dtype)

    # --- finalize (last srclen tile): output projection + tanh ------------
    @pl.when(s == pl.num_programs(1) - 1)
    def _():
        pre = (jnp.dot(acc_ref[...], w_out_ctx_ref[...],
                       preferred_element_type=jnp.float32)
               + jnp.dot(inp_ref[...].astype(jnp.float32), w_out_in_ref[...],
                         preferred_element_type=jnp.float32))
        x_out_ref[...] = jnp.tanh(pre).astype(x_out_ref.dtype)


def prepare_attention_params(w_in, w_out, source_embed_dim):
    """One-time weight prep: transpose to (in, out) and split output_proj so the
    kernel never concatenates along the lane axis."""
    w_in_t = jnp.asarray(w_in, jnp.float32).T            # (Di, Ds)
    w_out_t = jnp.asarray(w_out, jnp.float32).T          # (Ds+Di, Do)
    w_out_ctx = w_out_t[:source_embed_dim]               # (Ds, Do)
    w_out_in = w_out_t[source_embed_dim:]                # (Di, Do)
    return w_in_t, w_out_ctx, w_out_in


def _select_tiles(S, B, Ds, src_itemsize):
    """VMEM-budgeted tiles.  TB is the sublane axis of the source block (multiple
    of 8 or the full batch); TS is a leading dim (no alignment constraint) sized
    so one pipeline buffer of (src + mask + attn_sum) stays ~<= 8 MiB."""
    if B <= 8:
        tb = B
    else:
        tb = min(256, (B // 8) * 8)
        if B >= 16:
            # v7x: keep >= 2 iterations on the "parallel" batch axis so both
            # TensorCores get work (harmless on single-TC v5e/v6e).
            half = -(-B // 2)
            tb = min(tb, -(-half // 8) * 8)
        tb = max(tb, 8)
    lane_ds = ((max(Ds, 1) + 127) // 128) * 128
    per_ts_bytes = tb * (lane_ds * src_itemsize + 128 * 4 + 128 * 4)
    budget = 8 * 1024 * 1024   # per buffer; Pallas double-buffers the blocks
    ts = max(1, min(S, budget // max(per_ts_bytes, 1)))
    return tb, ts


def attention_layer(inp, source_hids, padding_mask, params):
    """inp: (B, Di); source_hids: (S, B, Ds) in the PyTorch layout (f32 or bf16);
    padding_mask: (S, B) nonzero/True where padded; params from
    prepare_attention_params.  Returns (x_out (B, Do), attn_sum (S, B))."""
    w_in_t, w_out_ctx, w_out_in = params
    S, B, Ds = source_hids.shape
    Di = inp.shape[-1]
    Do = w_out_ctx.shape[-1]

    inp = jnp.asarray(inp, jnp.float32)                       # small
    src = jnp.asarray(source_hids)                            # keep layout & dtype
    mask = jnp.asarray(padding_mask, jnp.float32).reshape(S, B, 1)  # no transpose

    TB, TS = _select_tiles(S, B, Ds, jnp.dtype(src.dtype).itemsize)
    grid = (pl.cdiv(B, TB), pl.cdiv(S, TS))

    kernel = functools.partial(attention_layer_kernel,
                               s_total=S, mask_tail=(S % TS != 0))

    x_out, attn3 = pl.pallas_call(
        kernel,
        out_shape=(jax.ShapeDtypeStruct((B, Do), jnp.float32),
                   jax.ShapeDtypeStruct((S, B, 1), jnp.float32)),
        grid=grid,
        in_specs=[
            pl.BlockSpec((TB, Di), lambda b, s: (b, 0)),         # input
            pl.BlockSpec((TS, TB, Ds), lambda b, s: (s, b, 0)),  # source_hids (S,B,Ds)
            pl.BlockSpec((TS, TB, 1), lambda b, s: (s, b, 0)),   # padding mask
            pl.BlockSpec((Di, Ds), lambda b, s: (0, 0)),         # w_in_t
            pl.BlockSpec((Ds, Do), lambda b, s: (0, 0)),         # w_out_ctx
            pl.BlockSpec((Di, Do), lambda b, s: (0, 0)),         # w_out_in
        ],
        out_specs=(
            pl.BlockSpec((TB, Do), lambda b, s: (b, 0)),         # resident over s
            pl.BlockSpec((TS, TB, 1), lambda b, s: (s, b, 0)),
        ),
        scratch_shapes=[
            pltpu.VMEM((TB, Ds), jnp.float32),   # x = input_proj(input)
            pltpu.VMEM((TB, Ds), jnp.float32),   # ctx accumulator
        ],
        compiler_params=pltpu.CompilerParams(
            dimension_semantics=("parallel", "arbitrary"),
            vmem_limit_bytes=48 * 1024 * 1024),
    )(inp, src, mask, w_in_t, w_out_ctx, w_out_in)

    return x_out, attn3.reshape(S, B)


def attention_layer_ref(inp, source_hids, padding_mask, w_in, w_out):
    """Pure-JAX reference mirroring the PyTorch module."""
    x = inp @ w_in.T
    scores = source_hids * x[None, :, :]
    scores = jnp.where(padding_mask[:, :, None] > 0.5, -1000000.0, scores)
    attn = jax.nn.softmax(scores, axis=2)
    ctx = jnp.sum(attn * source_hids, axis=0)
    out = jnp.tanh(jnp.concatenate([ctx, inp], axis=1) @ w_out.T)
    return out, jnp.sum(attn, axis=2)


if __name__ == "__main__":
    # Small, deterministic shapes consistent with the module.
    S, B = 8, 2
    Di, Ds, Do = 32, 32, 32

    key = jax.random.PRNGKey(0)
    k1, k2, k3, k4 = jax.random.split(key, 4)

    inp = jax.random.normal(k1, (B, Di), dtype=jnp.float32)
    source_hids = jax.random.normal(k2, (S, B, Ds), dtype=jnp.float32)

    # Padding mask: last 2 source steps of batch element 1 are padded.
    padding_mask = jnp.zeros((S, B), dtype=jnp.float32).at[S - 2:, 1].set(1.0)

    # Parameter init mirroring Linear(): uniform(-0.1, 0.1), bias=False.
    w_in = jax.random.uniform(k3, (Ds, Di), minval=-0.1, maxval=0.1,
                              dtype=jnp.float32)
    w_out = jax.random.uniform(k4, (Do, Ds + Di), minval=-0.1, maxval=0.1,
                               dtype=jnp.float32)

    # Weight prep happens once, outside the per-call path.
    params = prepare_attention_params(w_in, w_out, Ds)

    x_out, attn_sum = attention_layer(inp, source_hids, padding_mask, params)
    jax.block_until_ready((x_out, attn_sum))

    x_ref, attn_ref = attention_layer_ref(inp, source_hids, padding_mask, w_in, w_out)
    assert x_out.shape == (B, Do) and attn_sum.shape == (S, B)
    # Tolerance loosened vs exact f32: softmax denom uses the EUP approx reciprocal.
    assert jnp.allclose(x_out, x_ref, atol=5e-3, rtol=5e-3)
    assert jnp.allclose(attn_sum, attn_ref, atol=5e-3, rtol=5e-3)

    # bf16 source_hids path: halved DMA on the dominant tensor, upcast in-kernel.
    x_bf, attn_bf = attention_layer(inp, source_hids.astype(jnp.bfloat16),
                                    padding_mask, params)
    jax.block_until_ready((x_bf, attn_bf))
    assert jnp.allclose(x_bf, x_ref, atol=5e-2, rtol=5e-2)
    assert jnp.allclose(attn_bf, attn_ref, atol=5e-2, rtol=5e-2)

    print("KERNEL_OK")
</pallas_src>

<mosaic_0001>
module attributes {stable_mosaic.version = 11 : i64} {
  func.func @attention_layer_kernel(%arg0: i32, %arg1: i32, %arg2: memref<2x32xf32, #tpu.memory_space<vmem>>, %arg3: memref<8x2x32xf32, #tpu.memory_space<vmem>>, %arg4: memref<8x2x1xf32, #tpu.memory_space<vmem>>, %arg5: memref<32x32xf32, #tpu.memory_space<vmem>>, %arg6: memref<32x32xf32, #tpu.memory_space<vmem>>, %arg7: memref<32x32xf32, #tpu.memory_space<vmem>>, %arg8: memref<2x32xf32, #tpu.memory_space<vmem>>, %arg9: memref<8x2x1xf32, #tpu.memory_space<vmem>>, %arg10: memref<2x32xf32, #tpu.memory_space<vmem>>, %arg11: memref<2x32xf32, #tpu.memory_space<vmem>>) attributes {dimension_semantics = [#tpu.dimension_semantics<parallel>, #tpu.dimension_semantics<arbitrary>], iteration_bounds = array<i64: 1, 1>, scalar_prefetch = 0 : i64, scratch_operands = 2 : i64, tpu.core_type = #tpu.core_type<tc>, window_params = [{transform_indices = @transform_0, window_bounds = array<i64: 2, 32>}, {transform_indices = @transform_1, window_bounds = array<i64: 8, 2, 32>}, {transform_indices = @transform_2, window_bounds = array<i64: 8, 2, 1>}, {pipeline_mode = #tpu.pipeline_mode<synchronous>, transform_indices = @transform_3, window_bounds = array<i64: 32, 32>}, {pipeline_mode = #tpu.pipeline_mode<synchronous>, transform_indices = @transform_4, window_bounds = array<i64: 32, 32>}, {pipeline_mode = #tpu.pipeline_mode<synchronous>, transform_indices = @transform_5, window_bounds = array<i64: 32, 32>}, {transform_indices = @transform_6, window_bounds = array<i64: 2, 32>}, {transform_indices = @transform_7, window_bounds = array<i64: 8, 2, 1>}]} {
    %c0_i32 = arith.constant 0 : i32
    %0 = arith.cmpi eq, %arg1, %c0_i32 : i32
    %1 = arith.extui %0 : i1 to i32
    %c0_i32_0 = arith.constant 0 : i32
    %2 = arith.cmpi ne, %1, %c0_i32_0 : i32
    scf.if %2 {
      %cst_21 = arith.constant 0.000000e+00 : f32
      %35 = vector.broadcast %cst_21 : f32 to vector<2x32xf32>
      %c0_22 = arith.constant 0 : index
      %c0_23 = arith.constant 0 : index
      %36 = vector.load %arg11[%c0_22, %c0_23] : memref<2x32xf32, #tpu.memory_space<vmem>>, vector<2x32xf32>
      tpu.vector_store %arg11[%c0_22, %c0_23], %35 {strides = array<i32>} : memref<2x32xf32, #tpu.memory_space<vmem>>, vector<2x32xf32>,
      %c0_24 = arith.constant 0 : index
      %c0_25 = arith.constant 0 : index
      %37 = vector.load %arg2[%c0_24, %c0_25] : memref<2x32xf32, #tpu.memory_space<vmem>>, vector<2x32xf32>
      %c0_26 = arith.constant 0 : index
      %c0_27 = arith.constant 0 : index
      %38 = vector.load %arg5[%c0_26, %c0_27] : memref<32x32xf32, #tpu.memory_space<vmem>>, vector<32x32xf32>
      %cst_28 = arith.constant dense<0.000000e+00> : vector<2x32xf32>
      %39 = tpu.matmul %37, %38, %cst_28 {dimension_numbers = #tpu.dot_dimension_numbers<[1], [0], [0], [1], [0, 0, 1, 1], [], []>} : vector<2x32xf32>, vector<32x32xf32>, vector<2x32xf32> -> vector<2x32xf32>
      %c0_29 = arith.constant 0 : index
      %c0_30 = arith.constant 0 : index
      %40 = vector.load %arg10[%c0_29, %c0_30] : memref<2x32xf32, #tpu.memory_space<vmem>>, vector<2x32xf32>
      tpu.vector_store %arg10[%c0_29, %c0_30], %39 {strides = array<i32>} : memref<2x32xf32, #tpu.memory_space<vmem>>, vector<2x32xf32>,
    } else {
    }
    %c0 = arith.constant 0 : index
    %c0_1 = arith.constant 0 : index
    %c0_2 = arith.constant 0 : index
    %3 = vector.load %arg3[%c0, %c0_1, %c0_2] : memref<8x2x32xf32, #tpu.memory_space<vmem>>, vector<8x2x32xf32>
    %c0_3 = arith.constant 0 : index
    %c0_4 = arith.constant 0 : index
    %4 = vector.load %arg10[%c0_3, %c0_4] : memref<2x32xf32, #tpu.memory_space<vmem>>, vector<2x32xf32>
    %5 = vector.shape_cast %4 : vector<2x32xf32> to vector<1x2x32xf32>
    %6 = vector.broadcast %5 : vector<1x2x32xf32> to vector<8x2x32xf32>
    %7 = arith.mulf %3, %6 : vector<8x2x32xf32>
    %c0_5 = arith.constant 0 : index
    %c0_6 = arith.constant 0 : index
    %c0_7 = arith.constant 0 : index
    %8 = vector.load %arg4[%c0_5, %c0_6, %c0_7] : memref<8x2x1xf32, #tpu.memory_space<vmem>>, vector<8x2x1xf32>
    %cst = arith.constant 0.000000e+00 : f32
    %9 = vector.broadcast %cst : f32 to vector<8x2x1xf32>
    %10 = arith.cmpf one, %8, %9 : vector<8x2x1xf32>
    %cst_8 = arith.constant -1.000000e+06 : f32
    %11 = vector.shape_cast %10 : vector<8x2x1xi1> to vector<8x2x1xi1>
    %12 = vector.broadcast %11 : vector<8x2x1xi1> to vector<8x2x32xi1>
    %13 = vector.broadcast %cst_8 : f32 to vector<8x2x32xf32>
    %14 = arith.select %12, %13, %7 : vector<8x2x32xi1>, vector<8x2x32xf32>
    %cst_9 = arith.constant dense<0xFF800000> : vector<8x2xf32>
    %15 = vector.multi_reduction <maximumf>, %14, %cst_9 [2] : vector<8x2x32xf32> to vector<8x2xf32>
    %16 = vector.shape_cast %15 : vector<8x2xf32> to vector<8x2x1xf32>
    %17 = vector.broadcast %16 : vector<8x2x1xf32> to vector<8x2x32xf32>
    %18 = arith.subf %14, %17 : vector<8x2x32xf32>
    %19 = math.exp %18 : vector<8x2x32xf32>
    %cst_10 = arith.constant dense<0.000000e+00> : vector<8x2xf32>
    %20 = vector.multi_reduction <add>, %19, %cst_10 [2] : vector<8x2x32xf32> to vector<8x2xf32>
    %21 = vector.shape_cast %20 : vector<8x2xf32> to vector<8x2x1xf32>
    %22 = tpu.reciprocal %21 {approx = true} : vector<8x2x1xf32> -> vector<8x2x1xf32>
    %c0_11 = arith.constant 0 : index
    %c0_12 = arith.constant 0 : index
    %23 = vector.load %arg11[%c0_11, %c0_12] : memref<2x32xf32, #tpu.memory_space<vmem>>, vector<2x32xf32>
    %24 = arith.mulf %19, %3 : vector<8x2x32xf32>
    %25 = vector.broadcast %22 : vector<8x2x1xf32> to vector<8x2x32xf32>
    %26 = arith.mulf %24, %25 : vector<8x2x32xf32>
    %cst_13 = arith.constant dense<0.000000e+00> : vector<2x32xf32>
    %27 = vector.multi_reduction <add>, %26, %cst_13 [0] : vector<8x2x32xf32> to vector<2x32xf32>
    %28 = arith.addf %23, %27 : vector<2x32xf32>
    %c0_14 = arith.constant 0 : index
    %c0_15 = arith.constant 0 : index
    %29 = vector.load %arg11[%c0_14, %c0_15] : memref<2x32xf32, #tpu.memory_space<vmem>>, vector<2x32xf32>
    tpu.vector_store %arg11[%c0_14, %c0_15], %28 {strides = array<i32>} : memref<2x32xf32, #tpu.memory_space<vmem>>, vector<2x32xf32>,
    %30 = arith.mulf %21, %22 : vector<8x2x1xf32>
    %c0_16 = arith.constant 0 : index
    %c0_17 = arith.constant 0 : index
    %c0_18 = arith.constant 0 : index
    %31 = vector.load %arg9[%c0_16, %c0_17, %c0_18] : memref<8x2x1xf32, #tpu.memory_space<vmem>>, vector<8x2x1xf32>
    tpu.vector_store %arg9[%c0_16, %c0_17, %c0_18], %30 {strides = array<i32>} : memref<8x2x1xf32, #tpu.memory_space<vmem>>, vector<8x2x1xf32>,
    %c0_i32_19 = arith.constant 0 : i32
    %32 = arith.cmpi eq, %arg1, %c0_i32_19 : i32
    %33 = arith.extui %32 : i1 to i32
    %c0_i32_20 = arith.constant 0 : i32
    %34 = arith.cmpi ne, %33, %c0_i32_20 : i32
    scf.if %34 {
      %c0_21 = arith.constant 0 : index
      %c0_22 = arith.constant 0 : index
      %35 = vector.load %arg11[%c0_21, %c0_22] : memref<2x32xf32, #tpu.memory_space<vmem>>, vector<2x32xf32>
      %c0_23 = arith.constant 0 : index
      %c0_24 = arith.constant 0 : index
      %36 = vector.load %arg6[%c0_23, %c0_24] : memref<32x32xf32, #tpu.memory_space<vmem>>, vector<32x32xf32>
      %cst_25 = arith.constant dense<0.000000e+00> : vector<2x32xf32>
      %37 = tpu.matmul %35, %36, %cst_25 {dimension_numbers = #tpu.dot_dimension_numbers<[1], [0], [0], [1], [0, 0, 1, 1], [], []>} : vector<2x32xf32>, vector<32x32xf32>, vector<2x32xf32> -> vector<2x32xf32>
      %c0_26 = arith.constant 0 : index
      %c0_27 = arith.constant 0 : index
      %38 = vector.load %arg2[%c0_26, %c0_27] : memref<2x32xf32, #tpu.memory_space<vmem>>, vector<2x32xf32>
      %c0_28 = arith.constant 0 : index
      %c0_29 = arith.constant 0 : index
      %39 = vector.load %arg7[%c0_28, %c0_29] : memref<32x32xf32, #tpu.memory_space<vmem>>, vector<32x32xf32>
      %cst_30 = arith.constant dense<0.000000e+00> : vector<2x32xf32>
      %40 = tpu.matmul %38, %39, %cst_30 {dimension_numbers = #tpu.dot_dimension_numbers<[1], [0], [0], [1], [0, 0, 1, 1], [], []>} : vector<2x32xf32>, vector<32x32xf32>, vector<2x32xf32> -> vector<2x32xf32>
      %41 = arith.addf %37, %40 : vector<2x32xf32>
      %42 = math.tanh %41 : vector<2x32xf32>
      %c0_31 = arith.constant 0 : index
      %c0_32 = arith.constant 0 : index
      %43 = vector.load %arg8[%c0_31, %c0_32] : memref<2x32xf32, #tpu.memory_space<vmem>>, vector<2x32xf32>
      tpu.vector_store %arg8[%c0_31, %c0_32], %42 {strides = array<i32>} : memref<2x32xf32, #tpu.memory_space<vmem>>, vector<2x32xf32>,
    } else {
    }
    return
  }
  func.func @transform_0(%arg0: i32, %arg1: i32) -> (i32, i32) {
    %c0_i32 = arith.constant 0 : i32
    %c0_i32_0 = arith.constant 0 : i32
    return %arg0, %c0_i32 : i32, i32
  }
  func.func @transform_1(%arg0: i32, %arg1: i32) -> (i32, i32, i32) {
    %c0_i32 = arith.constant 0 : i32
    %c0_i32_0 = arith.constant 0 : i32
    return %arg1, %arg0, %c0_i32 : i32, i32, i32
  }
  func.func @transform_2(%arg0: i32, %arg1: i32) -> (i32, i32, i32) {
    %c0_i32 = arith.constant 0 : i32
    %c0_i32_0 = arith.constant 0 : i32
    return %arg1, %arg0, %c0_i32 : i32, i32, i32
  }
  func.func @transform_3(%arg0: i32, %arg1: i32) -> (i32, i32) {
    %c0_i32 = arith.constant 0 : i32
    %c0_i32_0 = arith.constant 0 : i32
    %c0_i32_1 = arith.constant 0 : i32
    return %c0_i32, %c0_i32_0 : i32, i32
  }
  func.func @transform_4(%arg0: i32, %arg1: i32) -> (i32, i32) {
    %c0_i32 = arith.constant 0 : i32
    %c0_i32_0 = arith.constant 0 : i32
    %c0_i32_1 = arith.constant 0 : i32
    return %c0_i32, %c0_i32_0 : i32, i32
  }
  func.func @transform_5(%arg0: i32, %arg1: i32) -> (i32, i32) {
    %c0_i32 = arith.constant 0 : i32
    %c0_i32_0 = arith.constant 0 : i32
    %c0_i32_1 = arith.constant 0 : i32
    return %c0_i32, %c0_i32_0 : i32, i32
  }
  func.func @transform_6(%arg0: i32, %arg1: i32) -> (i32, i32) {
    %c0_i32 = arith.constant 0 : i32
    %c0_i32_0 = arith.constant 0 : i32
    return %arg0, %c0_i32 : i32, i32
  }
  func.func @transform_7(%arg0: i32, %arg1: i32) -> (i32, i32, i32) {
    %c0_i32 = arith.constant 0 : i32
    %c0_i32_0 = arith.constant 0 : i32
    return %arg1, %arg0, %c0_i32 : i32, i32, i32
  }
}

</mosaic_0001>

<bundles_post_ra>
// kernel: tpu_custom_call.1
= control target key start
LH: loop header
LB: loop body
LE: loop exit
PB: predicated region body
PF: predicated region fallthrough
CT: control target
= control target key end

     0   :  { %13 = vsyncpa [#allocation5], 0  ;;  %s785_s0 = inlined_call_operand.vmem [shape: f32[2,32], index: 0, kind: input, shape index: {}]   ;;  %s786_s1 = inlined_call_operand.vmem [shape: f32[8,2,32], index: 1, kind: input, shape index: {}]   ;;  %s787_s2 = inlined_call_operand.vmem [shape: f32[8,2,1], index: 2, kind: input, shape index: {}]   ;;  %s788_s3 = inlined_call_operand.hbm [shape: f32[32,32], index: 3, kind: input, shape index: {}]   ;;  %s789_s4 = inlined_call_operand.hbm [shape: f32[32,32], index: 4, kind: input, shape index: {}]   ;;  %s790_s5 = inlined_call_operand.hbm [shape: f32[32,32], index: 5, kind: input, shape index: {}]   ;;  %s791_s6 = inlined_call_operand.hbm [shape: f32[2,32], index: 6, kind: output, shape index: {0}]   ;;  %s792_s7 = inlined_call_operand.vmem [shape: f32[8,2,1], index: 7, kind: output, shape index: {1}]  }
   0x1   :  { %14 = vsyncpa [#allocation8], 0 }
   0x2   :  { %15 = vsyncpa [#allocation6], 0  ;;  %s39_s26 = sshll.u32 %s789_s4, 4  ;;  %s556_s27 = smov [#allocation7]   ;;  %s40_s26 = int_to_ptr.hbm [resolvable:$true] %s39_s26 }
   0x3   :  { %s41_s28 = sshll.u32 %s556_s27, 4  ;;  %s26_s8 = sshll.u32 %s788_s3, 4  ;;  %s42_s28 = int_to_ptr.vmem [resolvable:$true] %s41_s28  ;;  %s27_s8 = int_to_ptr.hbm [resolvable:$true] %s26_s8 }
   0x4   :  { %s557_s9 = smov 128   ;;  %s558_s10 = smov 8  }
   0x5   :  { %47 = dma.hbm_to_vmem [thread:$0]  %s40_s26, 512, %s42_s28, [#allocation8], %s557_s9, %s557_s9, %s558_s10  }
   0x6   :  { %s559_s11 = smov [#allocation4]   ;;  %s52_s15 = sshll.u32 %s790_s5, 4  ;;  %s53_s15 = int_to_ptr.hbm [resolvable:$true] %s52_s15 }
   0x7   :  { %s28_s12 = sshll.u32 %s559_s11, 4  ;;  %s560_s4 = smov [#allocation9]   ;;  %s29_s12 = int_to_ptr.vmem [resolvable:$true] %s28_s12 }
   0x8   :  { %34 = dma.hbm_to_vmem [thread:$0]  %s27_s8, 512, %s29_s12, [#allocation5], %s557_s9, %s557_s9, %s558_s10  }
   0x9   :  { %s54_s16 = sshll.u32 %s560_s4, 4  ;;  %s55_s16 = int_to_ptr.vmem [resolvable:$true] %s54_s16 }
   0xa   :  { %60 = dma.hbm_to_vmem [thread:$0]  %s53_s15, 512, %s55_s16, [#allocation8], %s557_s9, %s557_s9, %s558_s10  }
   0xb   :  { %550 = dma.done.wait [#allocation5], 512  }
   0xc   :  { %551 = vsyncadd [#allocation5], 4294966784 }
   0xd   :  { %552 = dma.done.wait [#allocation8], 1024  }
   0xe   :  { %553 = vsyncadd [#allocation8], 4294966272  ;;  %v561_v0 = vmov 0   ;;  %v83_v1 = vld [vmem:[#allocation4 + $0x18] sm:$0xff]  ;;  %v82_v2 = vld [vmem:[#allocation4 + $0x10] sm:$0xff]  ;;  %vm84_vm2 = vcmask 261120  }
   0xf   :  { %418 = vset.pattern.permute.xlu1 %v561_v0  ;;  %417 = vset.pattern.permute.xlu0 %v561_v0  ;;  %v128_v3 = vld [vmem:[%s787_s2 + $0x4] sm:$0x3]  ;;  %v81_v4 = vld [vmem:[#allocation4 + $0x8] sm:$0xff]  ;;  %v126_v5 = vld [vmem:[%s787_s2] sm:$0x3]  ;;  %vm77_vm9 = vcmask 254976  }
  0x10   :  { %419 = vset.pattern.permute.xlu2 %v561_v0  ;;  %100 = vmatpush.msra.mxu0 %v83_v1  ;;  %vm136_vm0 = vcmp.ne.f32.partialorder %v128_v3, 0.0  ;;  %vm134_vm1 = vcmp.ne.f32.partialorder %v126_v5, 0.0  ;;  %v129_v7 = vld [vmem:[%s787_s2 + $0x6] sm:$0x3]  ;;  %v127_v10 = vld [vmem:[%s787_s2 + $0x2] sm:$0x3] }
  0x11   :  { %v144_v6 = vsel %vm136_vm0, 1, %v561_v0  ;;  %v80_v8 = vld [vmem:[#allocation4] sm:$0xff]  ;;  %v142_v9 = vsel %vm134_vm1, 1, %v561_v0  ;;  %v79_v11 = vld [vmem:[%s785_s0] sm:$0x3]  ;;  %vm137_vm3 = vcmp.ne.f32.partialorder %v129_v7, 0.0 }
  0x12   :  { %101 = vmatpush.msra.mxu0 %v82_v2  ;;  %157 = vperm.xlu1 %418, %v144_v6   ;;  %v130_v12 = vld [vmem:[%s787_s2 + $0x8] sm:$0x3]  ;;  %vm135_vm5 = vcmp.ne.f32.partialorder %v127_v10, 0.0  ;;  %v131_v14 = vld [vmem:[%s787_s2 + $0xa] sm:$0x3]  ;;  %v145_v15 = vsel %vm137_vm3, 1, %v561_v0 }
  0x13   :  { %151 = vperm.xlu0 %417, %v142_v9   ;;  %vm138_vm4 = vcmp.ne.f32.partialorder %v130_v12, 0.0  ;;  %v143_v16 = vsel %vm135_vm5, 1, %v561_v0  ;;  %vm139_vm6 = vcmp.ne.f32.partialorder %v131_v14, 0.0  ;;  %v133_v17 = vld [vmem:[%s787_s2 + $0xe] sm:$0x3]  ;;  %vm313_vm3 = vcmask 1024  }
  0x14   :  { %102 = vmatpush.msra.mxu0 %v81_v4  ;;  %v146_v13 = vsel %vm138_vm4, 1, %v561_v0  ;;  %v132_v18 = vld [vmem:[%s787_s2 + $0xc] sm:$0x3]  ;;  %v147_v19 = vsel %vm139_vm6, 1, %v561_v0  ;;  %vm141_vm7 = vcmp.ne.f32.partialorder %v133_v17, 0.0  ;;  %s563_s14 = smov [#allocation10]  }
  0x15   :  { %163 = vperm.xlu2 %419, %v146_v13   ;;  %vm140_vm8 = vcmp.ne.f32.partialorder %v132_v18, 0.0  ;;  %v149_v20 = vsel %vm141_vm7, 1, %v561_v0  ;;  %v645_v27 = vld [vmem:[%s786_s1 + $0x4] sm:$0x3]  ;;  %v650_v28 = vld [vmem:[%s786_s1 + $0x2] sm:$0x3] }
  0x16   :  { %103 = vmatpush.msra.mxu0 %v80_v8  ;;  %v148_v21 = vsel %vm140_vm8, 1, %v561_v0  ;;  %v655_v29 = vld [vmem:[%s786_s1] sm:$0x3]  ;;  %v663_v34 = vld [vmem:[%s786_s1 + $0xc] sm:$0x3]  ;;  %s389_s15 = sshll.u32 %s563_s14, 4  ;;  %s390_s15 = int_to_ptr.vmem [resolvable:$true] %s389_s15 }
  0x17   :  { %406 = vmatmul.msk.f32.vlgmr.msra.gmra.mxu0 %vm84_vm2, %v79_v11  ;;  %v668_v35 = vld [vmem:[%s786_s1 + $0xa] sm:$0x3]  ;;  %v673_v36 = vld [vmem:[%s786_s1 + $0x6] sm:$0x3]  ;;  %v684_v52 = vld [vmem:[%s786_s1 + $0x8] sm:$0x3] }
  0x18   :  { %v693_v58 = vld [vmem:[%s786_s1 + $0xe] sm:$0x3]  ;;  %s391_s3 = sshll.u32 %s791_s6, 4  ;;  %s392_s3 = int_to_ptr.hbm [resolvable:$true] %s391_s3 }
  0x1a   :  { %160 = vperm.xlu1 %418, %v145_v15  }
  0x1b   :  { %154 = vperm.xlu0 %417, %v143_v16  }
  0x1d   :  { %166 = vperm.xlu2 %419, %v147_v19  }
  0x22   :  { %172 = vperm.xlu1 %418, %v149_v20  }
  0x23   :  { %169 = vperm.xlu0 %417, %v148_v21  }
  0x6f   :  { %v164_v24 = vpop.permute.xlu2 %163 }
  0x70   :  { %vm178_vm0 = vcmp.eq.s32.totalorder %v164_v24, 1 }
  0x77   :  { %v167_v37 = vpop.permute.xlu2 %166 }
  0x78   :  { %vm179_vm13 = vcmp.eq.s32.totalorder %v167_v37, 1 }
  0x84   :  { %v158_v26 = vpop.permute.xlu1 %157 }
  0x85   :  { %v152_v22 = vpop.permute.xlu0 %151  ;;  %vm176_vm10 = vcmp.eq.s32.totalorder %v158_v26, 1 }
  0x86   :  { %vm174_vm11 = vcmp.eq.s32.totalorder %v152_v22, 1 }
  0x8c   :  { %v161_v47 = vpop.permute.xlu1 %160 }
  0x8d   :  { %v155_v25 = vpop.permute.xlu0 %154  ;;  %vm177_vm15 = vcmp.eq.s32.totalorder %v161_v47, 1 }
  0x8e   :  { %vm175_vm12 = vcmp.eq.s32.totalorder %v155_v25, 1 }
  0x94   :  { %v105_v23 = vpop.f32.mrf.mxu0  ;;  %v173_v59 = vpop.permute.xlu1 %172 }
  0x95   :  { %108 = vst.msk [vmem:[#allocation2] sm:$0x3] %vm77_vm9, %v105_v23  ;;  %v170_v38 = vpop.permute.xlu0 %169  ;;  %vm181_vm1 = vcmp.eq.s32.totalorder %v173_v59, 1  ;;  %v328_v59 = vld [vmem:[#allocation7 + $0x10] sm:$0xff] }
  0x96   :  { %vm180_vm14 = vcmp.eq.s32.totalorder %v170_v38, 1 }
  0x9c   :  { %v117_v30 = vld [vmem:[#allocation2] sm:$0x3] }
  0x9d   :  { %v120_v31 = vmul.f32 %v117_v30, %v645_v27  ;;  %v119_v32 = vmul.f32 %v117_v30, %v650_v28  ;;  %v118_v33 = vmul.f32 %v117_v30, %v655_v29  ;;  %v124_v45 = vmul.f32 %v117_v30, %v663_v34 }
  0x9e   :  { %v123_v46 = vmul.f32 %v117_v30, %v668_v35  ;;  %v121_v48 = vmul.f32 %v117_v30, %v673_v36  ;;  %v122_v56 = vmul.f32 %v117_v30, %v684_v52  ;;  %v125_v61 = vmul.f32 %v117_v30, %v693_v58 }
  0x9f   :  { %v184_v39 = vsel %vm176_vm10, -1000000.0, %v120_v31  ;;  %v183_v40 = vsel %vm175_vm12, -1000000.0, %v119_v32  ;;  %v182_v41 = vsel %vm174_vm11, -1000000.0, %v118_v33 }
  0xa0   :  { %v197_v42 = vsel %vm77_vm9, %v184_v39, -inf  ;;  %v194_v43 = vsel %vm77_vm9, %v183_v40, -inf  ;;  %v191_v44 = vsel %vm77_vm9, %v182_v41, -inf  ;;  %v188_v49 = vsel %vm180_vm14, -1000000.0, %v124_v45 }
  0xa1   :  { %198 = vmax.xlane.f32.xlu1 %v197_v42  ;;  %195 = vmax.xlane.f32.xlu0 %v194_v43  ;;  %v187_v50 = vsel %vm179_vm13, -1000000.0, %v123_v46  ;;  %v185_v51 = vsel %vm177_vm15, -1000000.0, %v121_v48  ;;  %v209_v53 = vsel %vm77_vm9, %v188_v49, -inf  ;;  %v562_v46 = vmov 0.0  }
  0xa2   :  { %192 = vmax.xlane.f32.xlu2 %v191_v44  ;;  %v206_v54 = vsel %vm77_vm9, %v187_v50, -inf  ;;  %v200_v55 = vsel %vm77_vm9, %v185_v51, -inf  ;;  %v186_v57 = vsel %vm178_vm0, -1000000.0, %v122_v56  ;;  %v189_v62 = vsel %vm181_vm1, -1000000.0, %v125_v61 }
  0xa3   :  { %v203_v60 = vsel %vm77_vm9, %v186_v57, -inf  ;;  %v212_v63 = vsel %vm77_vm9, %v189_v62, -inf  ;;  %78 = vst.msk [vmem:[#allocation3] sm:$0x3] %vm77_vm9, %v562_v46 }
  0xa9   :  { %210 = vmax.xlane.f32.xlu1 %v209_v53  ;;  %207 = vmax.xlane.f32.xlu0 %v206_v54 }
  0xaa   :  { %201 = vmax.xlane.f32.xlu2 %v200_v55 }
  0xb2   :  { %204 = vmax.xlane.f32.xlu2 %v203_v60 }
  0xba   :  { %213 = vmax.xlane.f32.xlu2 %v212_v63 }
 0x114   :  { %v199_v0 = vpop.xlane.xlu1 %198  ;;  %v196_v1 = vpop.xlane.xlu0 %195 }
 0x115   :  { %v217_v2 = vsub.f32 %v184_v39, %v199_v0  ;;  %v216_v3 = vsub.f32 %v183_v40, %v196_v1  ;;  %v193_v4 = vpop.xlane.xlu2 %192  ;;  %v334_v0 = vld [vmem:[#allocation9 + $0x18] sm:$0xff] }
 0x116   :  { %v215_v5 = vsub.f32 %v182_v41, %v193_v4  ;;  %351 = vmatpush.msra.mxu1 %v334_v0 }
 0x117   :  { %v227_v6 = vmul.f32 1.442695, %v217_v2  ;;  %v225_v7 = vmul.f32 1.442695, %v216_v3 }
 0x118   :  { %v223_v8 = vmul.f32 1.442695, %v215_v5  ;;  %v326_v5 = vld [vmem:[#allocation7] sm:$0xff] }
 0x119   :  { %420 = vpow2.f32 %v227_v6 }
 0x11a   :  { %422 = vpow2.f32 %v225_v7 }
 0x11b   :  { %424 = vpow2.f32 %v223_v8 }
 0x11c   :  { %v208_v9 = vpop.xlane.xlu0 %207  ;;  %v211_v12 = vpop.xlane.xlu1 %210 }
 0x11d   :  { %v220_v10 = vsub.f32 %v187_v50, %v208_v9  ;;  %v202_v11 = vpop.xlane.xlu2 %201  ;;  %v221_v20 = vsub.f32 %v188_v49, %v211_v12  ;;  %v332_v12 = vld [vmem:[#allocation9 + $0x8] sm:$0xff] }
 0x11e   :  { %v218_v13 = vsub.f32 %v185_v51, %v202_v11  ;;  %v333_v11 = vld [vmem:[#allocation9 + $0x10] sm:$0xff] }
 0x11f   :  { %v421_v14 = vpop.eup %420  ;;  %v233_v15 = vmul.f32 1.442695, %v220_v10  ;;  %v235_v23 = vmul.f32 1.442695, %v221_v20  ;;  %352 = vmatpush.msra.mxu1 %v333_v11 }
 0x120   :  { %v423_v16 = vpop.eup %422  ;;  %v229_v17 = vmul.f32 1.442695, %v218_v13  ;;  %v245_v18 = vsel %vm77_vm9, %v421_v14, 0.0  ;;  %v274_v54 = vmul.f32 %v421_v14, %v645_v27 }
 0x121   :  { %v425_v19 = vpop.eup %424  ;;  %v242_v21 = vsel %vm77_vm9, %v423_v16, 0.0  ;;  %246 = vadd.xlane.f32.xlu2 %v245_v18  ;;  %426 = vpow2.f32 %v233_v15  ;;  %v273_v51 = vmul.f32 %v423_v16, %v650_v28  ;;  %v327_v28 = vld [vmem:[#allocation7 + $0x8] sm:$0xff]  ;;  %353 = vmatpush.msra.mxu1 %v332_v12 }
 0x122   :  { %243 = vadd.xlane.f32.xlu1 %v242_v21  ;;  %v239_v22 = vsel %vm77_vm9, %v425_v19, 0.0  ;;  %428 = vpow2.f32 %v229_v17  ;;  %v272_v55 = vmul.f32 %v425_v19, %v655_v29  ;;  %v331_v19 = vld [vmem:[#allocation9] sm:$0xff] }
 0x123   :  { %240 = vadd.xlane.f32.xlu0 %v239_v22  ;;  %430 = vpow2.f32 %v235_v23  ;;  %354 = vmatpush.msra.mxu1 %v331_v19 }
 0x125   :  { %v205_v24 = vpop.xlane.xlu2 %204 }
 0x126   :  { %v219_v25 = vsub.f32 %v186_v57, %v205_v24  ;;  %v329_v57 = vld [vmem:[#allocation7 + $0x18] sm:$0xff] }
 0x127   :  { %v701_v26 = vpop.eup %426  ;;  %374 = vmatpush.msra.mxu2 %v329_v57 }
 0x128   :  { %v231_v30 = vmul.f32 1.442695, %v219_v25  ;;  %v703_v31 = vpop.eup %428  ;;  %v254_v32 = vsel %vm77_vm9, %v701_v26, 0.0  ;;  %v277_v22 = vmul.f32 %v701_v26, %v668_v35 }
 0x129   :  { %255 = vadd.xlane.f32.xlu2 %v254_v32  ;;  %v248_v33 = vsel %vm77_vm9, %v703_v31, 0.0  ;;  %v709_v39 = vpop.eup %430  ;;  %375 = vmatpush.msra.mxu2 %v328_v59  ;;  %v275_v10 = vmul.f32 %v703_v31, %v673_v36  ;;  %v330_v36 = vld [vmem:[%s785_s0] sm:$0x3] }
 0x12a   :  { %432 = vpow2.f32 %v231_v30  ;;  %v257_v43 = vsel %vm77_vm9, %v709_v39, 0.0  ;;  %407 = vmatmul.msk.f32.vlgmr.msra.gmra.mxu1 %vm84_vm2, %v330_v36  ;;  %v278_v30 = vmul.f32 %v709_v39, %v663_v34 }
 0x12b   :  { %249 = vadd.xlane.f32.xlu0 %v248_v33  ;;  %376 = vmatpush.msra.mxu2 %v327_v28 }
 0x12d   :  { %v214_v37 = vpop.xlane.xlu2 %213  ;;  %377 = vmatpush.msra.mxu2 %v326_v5 }
 0x12e   :  { %v222_v38 = vsub.f32 %v189_v62, %v214_v37 }
 0x130   :  { %v711_v40 = vpop.eup %432  ;;  %v237_v41 = vmul.f32 1.442695, %v222_v38 }
 0x131   :  { %v251_v42 = vsel %vm77_vm9, %v711_v40, 0.0  ;;  %v276_v23 = vmul.f32 %v711_v40, %v684_v52 }
 0x132   :  { %434 = vpow2.f32 %v237_v41  ;;  %252 = vadd.xlane.f32.xlu1 %v251_v42 }
 0x133   :  { %258 = vadd.xlane.f32.xlu0 %v257_v43 }
 0x138   :  { %v717_v44 = vpop.eup %434 }
 0x139   :  { %v260_v45 = vsel %vm77_vm9, %v717_v44, 0.0  ;;  %v279_v26 = vmul.f32 %v717_v44, %v693_v58 }
 0x13a   :  { %261 = vadd.xlane.f32.xlu1 %v260_v45 }
 0x194   :  { %v247_v47 = vpop.xlane.xlu2 %246 }
 0x195   :  { %v244_v48 = vpop.xlane.xlu1 %243  ;;  %436 = vrcp.f32 %v247_v47 }
 0x196   :  { %438 = vrcp.f32 %v244_v48  ;;  %v241_v49 = vpop.xlane.xlu0 %240 }
 0x197   :  { %440 = vrcp.f32 %v241_v49 }
 0x19b   :  { %v437_v50 = vpop.eup %436 }
 0x19c   :  { %v439_v53 = vpop.eup %438  ;;  %v307_v56 = vmul.f32 %v437_v50, %v247_v47  ;;  %v256_v63 = vpop.xlane.xlu2 %255  ;;  %v282_v3 = vmul.f32 %v437_v50, %v274_v54  ;;  %v271_v47 = vld [vmem:[#allocation3] sm:$0x3] }
 0x19d   :  { %v441_v60 = vpop.eup %440  ;;  %v281_v61 = vmul.f32 %v439_v53, %v273_v51  ;;  %v306_v62 = vmul.f32 %v439_v53, %v244_v48  ;;  %442 = vrcp.f32 %v256_v63 }
 0x19e   :  { %v280_v1 = vmul.f32 %v441_v60, %v272_v55  ;;  %v305_v2 = vmul.f32 %v441_v60, %v241_v49  ;;  %316 = vst.msk [vmem:[%s792_s7 + $0x4] sm:$0x3] %vm313_vm3, %v307_v56  ;;  %v250_v27 = vpop.xlane.xlu0 %249  ;;  %v291_v7 = vsel %vm77_vm9, %v282_v3, 0.0 }
 0x19f   :  { %v289_v29 = vsel %vm77_vm9, %v281_v61, 0.0  ;;  %315 = vst.msk [vmem:[%s792_s7 + $0x2] sm:$0x3] %vm313_vm3, %v306_v62  ;;  %444 = vrcp.f32 %v250_v27 }
 0x1a0   :  { %v288_v4 = vsel %vm77_vm9, %v280_v1, 0.0  ;;  %314 = vst.msk [vmem:[%s792_s7] sm:$0x3] %vm313_vm3, %v305_v2 }
 0x1a1   :  { %v290_v6 = vadd.f32 %v289_v29, %v288_v4 }
 0x1a3   :  { %v292_v8 = vadd.f32 %v291_v7, %v290_v6  ;;  %v443_v9 = vpop.eup %442 }
 0x1a4   :  { %v310_v14 = vmul.f32 %v443_v9, %v256_v63  ;;  %v285_v31 = vmul.f32 %v443_v9, %v277_v22 }
 0x1a5   :  { %v445_v13 = vpop.eup %444  ;;  %v253_v15 = vpop.xlane.xlu1 %252 }
 0x1a6   :  { %v283_v16 = vmul.f32 %v445_v13, %v275_v10  ;;  %v308_v17 = vmul.f32 %v445_v13, %v250_v27  ;;  %v259_v18 = vpop.xlane.xlu0 %258  ;;  %446 = vrcp.f32 %v253_v15  ;;  %319 = vst.msk [vmem:[%s792_s7 + $0xa] sm:$0x3] %vm313_vm3, %v310_v14  ;;  %v297_v35 = vsel %vm77_vm9, %v285_v31, 0.0 }
 0x1a7   :  { %448 = vrcp.f32 %v259_v18  ;;  %v356_v58 = vpop.f32.mrf.mxu1 }
 0x1a8   :  { %v293_v20 = vsel %vm77_vm9, %v283_v16, 0.0  ;;  %317 = vst.msk [vmem:[%s792_s7 + $0x6] sm:$0x3] %vm313_vm3, %v308_v17 }
 0x1a9   :  { %v294_v21 = vadd.f32 %v293_v20, %v292_v8 }
 0x1ac   :  { %v447_v24 = vpop.eup %446 }
 0x1ad   :  { %v449_v25 = vpop.eup %448  ;;  %v284_v32 = vmul.f32 %v447_v24, %v276_v23  ;;  %v309_v33 = vmul.f32 %v447_v24, %v253_v15  ;;  %v262_v37 = vpop.xlane.xlu1 %261 }
 0x1ae   :  { %v311_v38 = vmul.f32 %v449_v25, %v259_v18  ;;  %450 = vrcp.f32 %v262_v37  ;;  %v286_v41 = vmul.f32 %v449_v25, %v278_v30 }
 0x1af   :  { %v295_v42 = vsel %vm77_vm9, %v284_v32, 0.0  ;;  %318 = vst.msk [vmem:[%s792_s7 + $0x8] sm:$0x3] %vm313_vm3, %v309_v33 }
 0x1b0   :  { %320 = vst.msk [vmem:[%s792_s7 + $0xc] sm:$0x3] %vm313_vm3, %v311_v38  ;;  %v296_v34 = vadd.f32 %v295_v42, %v294_v21  ;;  %v299_v39 = vsel %vm77_vm9, %v286_v41, 0.0 }
 0x1b2   :  { %v298_v52 = vadd.f32 %v297_v35, %v296_v34 }
 0x1b4   :  { %v451_v40 = vpop.eup %450  ;;  %v300_v43 = vadd.f32 %v299_v39, %v298_v52 }
 0x1b5   :  { %v287_v45 = vmul.f32 %v451_v40, %v279_v26  ;;  %v312_v46 = vmul.f32 %v451_v40, %v262_v37 }
 0x1b7   :  { %v301_v48 = vsel %vm77_vm9, %v287_v45, 0.0  ;;  %321 = vst.msk [vmem:[%s792_s7 + $0xe] sm:$0x3] %vm313_vm3, %v312_v46 }
 0x1b8   :  { %v302_v49 = vadd.f32 %v301_v48, %v300_v43 }
 0x1ba   :  { %v303_v50 = vadd.f32 %v302_v49, %v271_v47 }
 0x1bc   :  { %304 = vst.msk [vmem:[#allocation3] sm:$0x3] %vm77_vm9, %v303_v50 }
 0x1c3   :  { %v325_v51 = vld [vmem:[#allocation3] sm:$0x3] }
 0x1c4   :  { %408 = vmatmul.msk.f32.vlgmr.msra.gmra.mxu2 %vm84_vm2, %v325_v51 }
 0x247   :  { %v379_v44 = vpop.f32.mrf.mxu2 }
 0x248   :  { %v380_v53 = vadd.f32 %v379_v44, %v356_v58 }
 0x24a   :  { %452 = vtanh.f32 %v380_v53 }
 0x250   :  { %v453_v54 = vpop.eup %452 }
 0x251   :  { %383 = vst.msk [vmem:[#allocation10] sm:$0x3] %vm77_vm9, %v453_v54 }
 0x252   :  { %394 = dma.vmem_to_hbm [thread:$0]  %s390_s15, 32, %s392_s3, [#allocation6]  }
 0x253   :  { %554 = dma.done.wait [#allocation6], 32  }
 0x254   :  { %555 = vsyncadd [#allocation6], 4294967264 }
 0x255   :  { %403 = vsyncpa [#allocation5], 1 }
 0x256   :  { %404 = vsyncpa [#allocation8], 1 }
 0x257   :  { %405 = vsyncpa [#allocation6], 1 }

</bundles_post_ra>
